<compile_context>
chip_gen: v6e
topology: v6e:2x2x1
jax: 0.10.0
libtpu: 0.0.40
codegen_flags: <defaults>
</compile_context>

<pallas_src>
import functools

import jax
import jax.numpy as jnp
from jax.experimental import pallas as pl
from jax.experimental.pallas import tpu as pltpu


_TARGET_BLOCK_BYTES = 2 * 1024 * 1024     # ~2 MiB (f32) payload per input per step
_VMEM_LIMIT_BYTES = 48 * 1024 * 1024      # fits v5e/v6e/v7x physical VMEM


def _choose_tile_h(c, h, w):
    """Rows of H per block: a multiple of 8 (or full H when H < 8), sized so a
    block holds roughly _TARGET_BLOCK_BYTES of f32 payload."""
    # TODO(synk): tile W as a third grid axis if C*8*W*4 ever exceeds VMEM.
    w_pad = -(-w // 128) * 128                  # lane padding in VMEM
    bytes_per_row = c * w_pad * 4               # f32 footprint of one H row
    th = max(8, (_TARGET_BLOCK_BYTES // bytes_per_row) // 8 * 8)
    if h >= 8:
        th = min(th, (h // 8) * 8)
    else:
        th = h                                  # full dim, single block
    return th


def _make_sph_kernel(n_inputs, h, tile_h, out_sub, need_mask):
    """Kernel over blocks x_i: (1, C, TILE_H, W); accumulates partial sums of
    (||x||_2(channels) - 1)^2 into the (1, out_sub, W) output block."""
    fold = tile_h // out_sub

    def kernel(*refs):
        x_refs = refs[:n_inputs]
        out_ref = refs[n_inputs]
        j = pl.program_id(1)

        @pl.when(j == 0)
        def _():
            out_ref[...] = jnp.zeros_like(out_ref)

        for x_ref in x_refs:                              # static unroll (2 inputs)
            x = x_ref[0].astype(jnp.float32)              # (C, TILE_H, W), cast in-vreg
            sq = jnp.sum(x * x, axis=0)                   # (TILE_H, W) channel reduce (VPU)
            d = jnp.sqrt(sq) - 1.0
            d2 = d * d
            if need_mask:                                 # ragged last H tile
                rows = jax.lax.broadcasted_iota(jnp.int32, d2.shape, 0) + j * tile_h
                d2 = jnp.where(rows < h, d2, 0.0)
            # Fold sublane-tile groups onto the resident output block (VPU adds).
            part = jnp.sum(d2.reshape(fold, out_sub, d2.shape[-1]), axis=0)
            out_ref[...] += part[None, :, :]

    return kernel


def _sum_sq_dist(*xs):
    """sum over tensors & positions of (||x||_2(dim=1) - 1)^2 for NCHW tensors
    of identical shape, using one fused pallas_call."""
    shape = xs[0].shape
    assert all(x.shape == shape for x in xs), "fused inputs must share a shape"
    n, c, h, w = shape

    tile_h = _choose_tile_h(c, h, w)
    num_j = -(-h // tile_h)
    need_mask = (h % tile_h) != 0
    out_sub = 8 if tile_h % 8 == 0 else tile_h            # only < 8 when H < 8

    kernel = _make_sph_kernel(len(xs), h, tile_h, out_sub, need_mask)
    in_spec = pl.BlockSpec((1, c, tile_h, w), lambda ni, ji: (ni, 0, ji, 0))

    out = pl.pallas_call(
        kernel,
        out_shape=jax.ShapeDtypeStruct((n, out_sub, w), jnp.float32),
        grid_spec=pltpu.PrefetchScalarGridSpec(
            num_scalar_prefetch=0,
            grid=(n, num_j),
            in_specs=[in_spec] * len(xs),
            out_specs=pl.BlockSpec((1, out_sub, w), lambda ni, ji: (ni, 0, 0)),
        ),
        compiler_params=pltpu.CompilerParams(
            dimension_semantics=("parallel", "arbitrary"),
            vmem_limit_bytes=_VMEM_LIMIT_BYTES),
    )(*xs)
    return jnp.sum(out)                                    # tiny (N, 8, W) reduce


@functools.partial(jax.jit, static_argnames=("weight",))
def _spherical_loss_jit(uvw_f, uvw_b, weight):
    nf, _, hf, wf = uvw_f.shape
    nb, _, hb, wb = uvw_b.shape
    if uvw_f.shape == uvw_b.shape:
        sph = _sum_sq_dist(uvw_f, uvw_b) / jnp.float32(nf * hf * wf)
    else:
        sph = (_sum_sq_dist(uvw_f) / jnp.float32(nf * hf * wf)
               + _sum_sq_dist(uvw_b) / jnp.float32(nb * hb * wb))
    return jnp.float32(weight) * sph


def spherical_loss(uvw_f, uvw_b, weight):
    """Matches SphericalLoss.forward: returns None when weight <= 0."""
    if weight <= 0:
        return None
    return _spherical_loss_jit(uvw_f, uvw_b, float(weight))


if __name__ == "__main__":
    key = jax.random.PRNGKey(0)
    k1, k2, k3, k4, k5, k6 = jax.random.split(key, 6)

    def ref_loss(f, b, w):
        df = jnp.sqrt(jnp.sum(f.astype(jnp.float32) ** 2, axis=1)) - 1.0
        db = jnp.sqrt(jnp.sum(b.astype(jnp.float32) ** 2, axis=1)) - 1.0
        return jnp.float32(w) * (jnp.mean(df ** 2) + jnp.mean(db ** 2))

    weight = 0.5

    # 1) main case: matching NCHW shapes -> fused single pallas_call
    f1 = jax.random.normal(k1, (2, 3, 16, 16), dtype=jnp.float32)
    b1 = jax.random.normal(k2, (2, 3, 16, 16), dtype=jnp.float32)
    out1 = jax.block_until_ready(spherical_loss(f1, b1, weight))
    exp1 = ref_loss(f1, b1, weight)
    assert jnp.allclose(out1, exp1, rtol=1e-5, atol=1e-5), (out1, exp1)

    # 2) ragged H (masked last tile) and W not a multiple of 128
    f2 = jax.random.normal(k3, (2, 3, 13, 20), dtype=jnp.float32)
    b2 = jax.random.normal(k4, (2, 3, 13, 20), dtype=jnp.float32)
    out2 = jax.block_until_ready(spherical_loss(f2, b2, weight))
    exp2 = ref_loss(f2, b2, weight)
    assert jnp.allclose(out2, exp2, rtol=1e-5, atol=1e-5), (out2, exp2)

    # 3) bf16 inputs (cast in-kernel) + mismatched shapes (two-call fallback)
    f3 = jax.random.normal(k5, (1, 3, 5, 12), dtype=jnp.bfloat16)
    b3 = jax.random.normal(k6, (1, 3, 16, 16), dtype=jnp.bfloat16)
    out3 = jax.block_until_ready(spherical_loss(f3, b3, weight))
    exp3 = ref_loss(f3, b3, weight)
    assert jnp.allclose(out3, exp3, rtol=1e-4, atol=1e-4), (out3, exp3)

    # 4) weight <= 0 path returns None, as in the PyTorch module
    assert spherical_loss(f1, b1, 0.0) is None

    print("KERNEL_OK")
</pallas_src>

<mosaic_0001>
module attributes {stable_mosaic.version = 11 : i64} {
  func.func @kernel(%arg0: i32, %arg1: i32, %arg2: memref<1x3x16x16xf32, #tpu.memory_space<vmem>>, %arg3: memref<1x3x16x16xf32, #tpu.memory_space<vmem>>, %arg4: memref<1x8x16xf32, #tpu.memory_space<vmem>>) attributes {dimension_semantics = [#tpu.dimension_semantics<parallel>, #tpu.dimension_semantics<arbitrary>], iteration_bounds = array<i64: 2, 1>, scalar_prefetch = 0 : i64, scratch_operands = 0 : i64, tpu.core_type = #tpu.core_type<tc>, window_params = [{transform_indices = @transform_0, window_bounds = array<i64: 1, 3, 16, 16>}, {transform_indices = @transform_1, window_bounds = array<i64: 1, 3, 16, 16>}, {transform_indices = @transform_2, window_bounds = array<i64: 1, 8, 16>}]} {
    %c0_i32 = arith.constant 0 : i32
    %0 = arith.cmpi eq, %arg1, %c0_i32 : i32
    %1 = arith.extui %0 : i1 to i32
    %c0_i32_0 = arith.constant 0 : i32
    %2 = arith.cmpi ne, %1, %c0_i32_0 : i32
    scf.if %2 {
      %cst_25 = arith.constant 0.000000e+00 : f32
      %31 = vector.broadcast %cst_25 : f32 to vector<1x8x16xf32>
      %c0_26 = arith.constant 0 : index
      %c0_27 = arith.constant 0 : index
      %c0_28 = arith.constant 0 : index
      %32 = vector.load %arg4[%c0_26, %c0_27, %c0_28] : memref<1x8x16xf32, #tpu.memory_space<vmem>>, vector<1x8x16xf32>
      tpu.vector_store %arg4[%c0_26, %c0_27, %c0_28], %31 {strides = array<i32>} : memref<1x8x16xf32, #tpu.memory_space<vmem>>, vector<1x8x16xf32>,
    } else {
    }
    %c0 = arith.constant 0 : index
    %c0_1 = arith.constant 0 : index
    %c0_2 = arith.constant 0 : index
    %c0_3 = arith.constant 0 : index
    %3 = vector.load %arg2[%c0, %c0_1, %c0_2, %c0_3] : memref<1x3x16x16xf32, #tpu.memory_space<vmem>>, vector<1x3x16x16xf32>
    %4 = vector.shape_cast %3 : vector<1x3x16x16xf32> to vector<3x16x16xf32>
    %5 = arith.mulf %4, %4 : vector<3x16x16xf32>
    %cst = arith.constant dense<0.000000e+00> : vector<16x16xf32>
    %6 = vector.multi_reduction <add>, %5, %cst [0] : vector<3x16x16xf32> to vector<16x16xf32>
    %7 = math.sqrt %6 : vector<16x16xf32>
    %cst_4 = arith.constant 1.000000e+00 : f32
    %8 = vector.broadcast %cst_4 : f32 to vector<16x16xf32>
    %9 = arith.subf %7, %8 : vector<16x16xf32>
    %10 = arith.mulf %9, %9 : vector<16x16xf32>
    %11 = vector.shape_cast %10 : vector<16x16xf32> to vector<2x8x16xf32>
    %cst_5 = arith.constant dense<0.000000e+00> : vector<8x16xf32>
    %12 = vector.multi_reduction <add>, %11, %cst_5 [0] : vector<2x8x16xf32> to vector<8x16xf32>
    %c0_6 = arith.constant 0 : index
    %c0_7 = arith.constant 0 : index
    %c0_8 = arith.constant 0 : index
    %13 = vector.load %arg4[%c0_6, %c0_7, %c0_8] : memref<1x8x16xf32, #tpu.memory_space<vmem>>, vector<1x8x16xf32>
    %14 = vector.shape_cast %12 : vector<8x16xf32> to vector<1x8x16xf32>
    %15 = arith.addf %13, %14 : vector<1x8x16xf32>
    %c0_9 = arith.constant 0 : index
    %c0_10 = arith.constant 0 : index
    %c0_11 = arith.constant 0 : index
    %16 = vector.load %arg4[%c0_9, %c0_10, %c0_11] : memref<1x8x16xf32, #tpu.memory_space<vmem>>, vector<1x8x16xf32>
    tpu.vector_store %arg4[%c0_9, %c0_10, %c0_11], %15 {strides = array<i32>} : memref<1x8x16xf32, #tpu.memory_space<vmem>>, vector<1x8x16xf32>,
    %c0_12 = arith.constant 0 : index
    %c0_13 = arith.constant 0 : index
    %c0_14 = arith.constant 0 : index
    %c0_15 = arith.constant 0 : index
    %17 = vector.load %arg3[%c0_12, %c0_13, %c0_14, %c0_15] : memref<1x3x16x16xf32, #tpu.memory_space<vmem>>, vector<1x3x16x16xf32>
    %18 = vector.shape_cast %17 : vector<1x3x16x16xf32> to vector<3x16x16xf32>
    %19 = arith.mulf %18, %18 : vector<3x16x16xf32>
    %cst_16 = arith.constant dense<0.000000e+00> : vector<16x16xf32>
    %20 = vector.multi_reduction <add>, %19, %cst_16 [0] : vector<3x16x16xf32> to vector<16x16xf32>
    %21 = math.sqrt %20 : vector<16x16xf32>
    %cst_17 = arith.constant 1.000000e+00 : f32
    %22 = vector.broadcast %cst_17 : f32 to vector<16x16xf32>
    %23 = arith.subf %21, %22 : vector<16x16xf32>
    %24 = arith.mulf %23, %23 : vector<16x16xf32>
    %25 = vector.shape_cast %24 : vector<16x16xf32> to vector<2x8x16xf32>
    %cst_18 = arith.constant dense<0.000000e+00> : vector<8x16xf32>
    %26 = vector.multi_reduction <add>, %25, %cst_18 [0] : vector<2x8x16xf32> to vector<8x16xf32>
    %c0_19 = arith.constant 0 : index
    %c0_20 = arith.constant 0 : index
    %c0_21 = arith.constant 0 : index
    %27 = vector.load %arg4[%c0_19, %c0_20, %c0_21] : memref<1x8x16xf32, #tpu.memory_space<vmem>>, vector<1x8x16xf32>
    %28 = vector.shape_cast %26 : vector<8x16xf32> to vector<1x8x16xf32>
    %29 = arith.addf %27, %28 : vector<1x8x16xf32>
    %c0_22 = arith.constant 0 : index
    %c0_23 = arith.constant 0 : index
    %c0_24 = arith.constant 0 : index
    %30 = vector.load %arg4[%c0_22, %c0_23, %c0_24] : memref<1x8x16xf32, #tpu.memory_space<vmem>>, vector<1x8x16xf32>
    tpu.vector_store %arg4[%c0_22, %c0_23, %c0_24], %29 {strides = array<i32>} : memref<1x8x16xf32, #tpu.memory_space<vmem>>, vector<1x8x16xf32>,
    return
  }
  func.func @transform_0(%arg0: i32, %arg1: i32) -> (i32, i32, i32, i32) {
    %c0_i32 = arith.constant 0 : i32
    %c0_i32_0 = arith.constant 0 : i32
    %c0_i32_1 = arith.constant 0 : i32
    return %arg0, %c0_i32, %arg1, %c0_i32_0 : i32, i32, i32, i32
  }
  func.func @transform_1(%arg0: i32, %arg1: i32) -> (i32, i32, i32, i32) {
    %c0_i32 = arith.constant 0 : i32
    %c0_i32_0 = arith.constant 0 : i32
    %c0_i32_1 = arith.constant 0 : i32
    return %arg0, %c0_i32, %arg1, %c0_i32_0 : i32, i32, i32, i32
  }
  func.func @transform_2(%arg0: i32, %arg1: i32) -> (i32, i32, i32) {
    %c0_i32 = arith.constant 0 : i32
    %c0_i32_0 = arith.constant 0 : i32
    %c0_i32_1 = arith.constant 0 : i32
    return %arg0, %c0_i32, %c0_i32_0 : i32, i32, i32
  }
}

</mosaic_0001>

<bundles_post_ra>
// kernel: _spherical_loss_jit.1
= control target key start
LH: loop header
LB: loop body
LE: loop exit
PB: predicated region body
PF: predicated region fallthrough
CT: control target
= control target key end

     0   :  { %7 = vsyncpa [#allocation3], 0  ;;  %s793_s0 = inlined_call_operand.hbm [shape: f32[2,3,16,16], index: 0, kind: input, shape index: {}]   ;;  %s794_s1 = inlined_call_operand.hbm [shape: f32[2,3,16,16], index: 1, kind: input, shape index: {}]   ;;  %s795_s2 = inlined_call_operand.vmem [shape: f32[2,8,16], index: 2, kind: output, shape index: {}]  }
   0x1   :  { %9 = vsyncpa [#allocation3 + $0x1], 0 }
   0x2   :  { %10 = vsyncpa [#allocation5], 0 }
   0x3   :  { %12 = vsyncpa [#allocation5 + $0x1], 0  ;;  %s647_s9 = smov 0   ;;  %s649_s10 = smov 0  }
   0x4   :  { %s651_s11 = smov 0   ;;  %s653_s12 = smov 0  }
   0x5   :  { %s655_s13 = smov 0   ;;  %s657_s14 = smov 0  }
   0x6 LB: > { %s425_s15 = sadd.s32 4294967295, %s625_s14   ;;  %s30_s16 = sadd.s32 1, %s621_s13  ;;  %s625_s14 = sphi %s657_s14, %s18_s14   ;;  %s621_s13 = sphi %s655_s13, %s803_s13   ;;  %s617_s12 = sphi %s653_s12, %s802_s12   ;;  %s613_s11 = sphi %s651_s11, %s801_s11   ;;  %s609_s10 = sphi %s649_s10, %s800_s10   ;;  %s605_s9 = sphi %s647_s9, %s799_s9  }
   0x7   : > { %p32_p0 = scmp.ge.s32.totalorder %s30_s16, 2  ;;  %s39_s17 = sadd.s32 1, %s613_s11 }
   0x8   : > { %p46_p1 = scmp.ne.s32.totalorder %s613_s11, %s609_s10  ;;  %p47_p2 = scmp.eq.s32.totalorder %s625_s14, 0 }
   0x9   : > { %s805_s16 = smov (%p32_p0, %s30_s16), 0  ;;  %p52_p4 = scmp.ne.s32.totalorder %s609_s10, %s605_s9 }
   0xa   : > { %p48_p3 = por %p47_p2, %p46_p1  ;;  %s34_s18 = ssub.s32 %s621_s13, %s805_s16 }
   0xb   : > { %p53_p5 = scmp.eq.s32.totalorder %s425_s15, 0  ;;  %p37_p6 = scmp.eq.s32.totalorder %s34_s18, 0 }
   0xc   : > { %p455_p8 = scmp.lt.s32.totalorder %s625_s14, 2  ;;  %s695_s21 = sand.u32 1, %s613_s11  }
   0xd   : > { %p686_p7 = por %p53_p5, %p52_p4  ;;  %s440_s22 = smul.u32 768, %s621_s13 }
   0xe   : > { %s692_s20 = scalar_select %p37_p6, %s613_s11, %s39_s17  }
   0xf   : > { %s439_s23 = smul.u32 48, %s695_s21  ;;  %s142_s26 = scalar_lea.hbm %s793_s0, %s440_s22 }
  0x10   : > { %p704_p9 = pnand %p455_p8, %p48_p3  ;;  %s131_s30 = scalar_lea.sflag [#allocation3], %s695_s21 }
  0x11   : > { %s134_s28 = scalar_lea.vmem [#allocation2], %s439_s23  ;;  %s627_s4 = smov [#allocation2]  }
  0x12   : > { %s143_s29 = sshll.u32 %s134_s28, 4  ;;  %p517_p10 = pneg %p704_p9  ;;  %s144_s29 = int_to_ptr.vmem [resolvable:$true] %s143_s29 }
  0x13   : > { %s528_s3 = scalar_lea.vmem %s144_s29, 768  ;;  %s533_s5 = sshll.u32 %s627_s4, 4  ;;  %s534_s5 = int_to_ptr.vmem [resolvable:$false] %s533_s5 }
  0x14   : > { %p529_p11 = scmp.ne.s32.totalorder %s144_s29, %s528_s3  ;;  %s535_s6 = scalar_lea.vmem %s534_s5, 1536 }
  0x15   : > { %p536_p0 = scmp.lt.s32.totalorder %s144_s29, %s534_s5  ;;  %p537_p1 = scmp.lt.s32.totalorder %s535_s6, %s528_s3 }
  0x16   : > { %p531_p12 = pnand %p529_p11, %p517_p10 }
  0x17   : > { %p538_p2 = por %p537_p1, %p536_p0 }
  0x18   : > { %p532_p13 = pneg %p531_p12 }
  0x1a   : > { %p539_p3 = pnand %p538_p2, %p532_p13 }
  0x1c   : > { %542 = shalt.err (!%p539_p3)
}
  0x1d   : > { %s628_s7 = smov 128   ;;  %s629_s8 = smov 8  }
  0x1e   : > { %451 = dma.hbm_to_vmem [thread:$0]  (!%p704_p9), %s142_s26, 768, %s144_s29, %s131_s30, %s628_s7, %s628_s7, %s629_s8  }
  0x1f   : > { %p431_p4 = scmp.ge.s32.totalorder %s625_s14, 1  ;;  %p174_p5 = scmp.lt.s32.totalorder %s625_s14, 3 }
  0x20   : > { %s165_s18 = scalar_lea.hbm %s794_s1, %s440_s22  ;;  %s157_s24 = scalar_lea.vmem [#allocation4], %s439_s23 }
  0x21   : > { %p718_p6 = pnand %p431_p4, %p174_p5  ;;  %s166_s25 = sshll.u32 %s157_s24, 4  ;;  %s167_s25 = int_to_ptr.vmem [resolvable:$true] %s166_s25 }
  0x22   : > { %s154_s28 = scalar_lea.sflag [#allocation5], %s695_s21  ;;  %s556_s3 = scalar_lea.vmem %s167_s25, 768 }
  0x23   : > { %p557_p8 = scmp.ne.s32.totalorder %s167_s25, %s556_s3  ;;  %s630_s26 = smov [#allocation4]  }
  0x24   : > { %s561_s29 = sshll.u32 %s630_s26, 4  ;;  %s562_s29 = int_to_ptr.vmem [resolvable:$false] %s561_s29 }
  0x25   : > { %p559_p11 = pnand %p557_p8, %p517_p10  ;;  %s563_s30 = scalar_lea.vmem %s562_s29, 1536 }
  0x26   : > { %p564_p13 = scmp.lt.s32.totalorder %s167_s25, %s562_s29  ;;  %p565_p0 = scmp.lt.s32.totalorder %s563_s30, %s556_s3 }
  0x27   : > { %p560_p12 = pneg %p559_p11 }
  0x28   : > { %p566_p1 = por %p565_p0, %p564_p13 }
  0x2a   : > { %p567_p2 = pnand %p566_p1, %p560_p12 }
  0x2c   : > { %570 = shalt.err (!%p567_p2)
}
  0x2d   : > { %454 = dma.hbm_to_vmem [thread:$0]  (!%p704_p9), %s165_s18, 768, %s167_s25, %s154_s28, %s628_s7, %s628_s7, %s629_s8  }
  0x2e   : > { %178 = sbr.rel (%p718_p6) target bundleno = 102 (0x66), region = 28  ;;  %s180_s21 = sand.u32 (!%p718_p6), 1, %s609_s10  }
  0x2f   : > { %s443_s22 = smul.u32 (!%p718_p6), 48, %s180_s21  ;;  %s181_s23 = scalar_lea.sflag (!%p718_p6), [#allocation3], %s180_s21 }
  0x31   : > { %s184_s4 = scalar_lea.vmem (!%p718_p6), [#allocation2], %s443_s22 }
  0x33   : > { %596 = dma.done.wait (%p686_p7), %s181_s23, 768  }
  0x34   : > { %598 = vsyncadd (%p686_p7), %s181_s23, 4294966528  ;;  %s190_s5 = scalar_lea.sflag [#allocation5], %s180_s21  ;;  %s193_s6 = scalar_lea.vmem [#allocation4], %s443_s22 }
  0x35   : > { %600 = dma.done.wait (%p686_p7), %s190_s5, 768  }
  0x36   : > { %602 = vsyncadd (%p686_p7), %s190_s5, 4294966528  ;;  %p220_p9 = scmp.lt.s32.totalorder %s617_s12, 1  ;;  %vm228_vm0 = vcmask 130048   ;;  %v631_v0 = vmov 0.0   ;;  %v230_v1 = vld [vmem:[%s184_s4] sm:$0xff]  ;;  %v231_v2 = vld [vmem:[%s184_s4 + $0x8] sm:$0xff] }
  0x37   : > { %v232_v3 = vld [vmem:[%s184_s4 + $0x10] sm:$0xff]  ;;  %v233_v4 = vld [vmem:[%s184_s4 + $0x18] sm:$0xff]  ;;  %v234_v5 = vld [vmem:[%s184_s4 + $0x20] sm:$0xff]  ;;  %v236_v7 = vmul.f32 %v230_v1, %v230_v1  ;;  %v237_v8 = vmul.f32 %v231_v2, %v231_v2 }
  0x38   : > { %s807_s12 = smov (!%p220_p9, %s617_s12), 1  ;;  %v235_v6 = vld [vmem:[%s184_s4 + $0x28] sm:$0xff]  ;;  %v238_v9 = vmul.f32 %v232_v3, %v232_v3  ;;  %v239_v10 = vmul.f32 %v233_v4, %v233_v4  ;;  %v240_v11 = vmul.f32 %v234_v5, %v234_v5  ;;  %v277_v13 = vld [vmem:[%s193_s6] sm:$0xff]  ;;  %v279_v15 = vld [vmem:[%s193_s6 + $0x10] sm:$0xff] }
  0x39   : > { %s432_s27 = sshll.u32 %s807_s12, 3  ;;  %v241_v12 = vmul.f32 %v235_v6, %v235_v6  ;;  %v278_v14 = vld [vmem:[%s193_s6 + $0x8] sm:$0xff]  ;;  %v243_v16 = vsel %vm228_vm0, %v236_v7, 0.0  ;;  %v248_v18 = vsel %vm228_vm0, %v237_v8, 0.0  ;;  %v280_v19 = vld [vmem:[%s193_s6 + $0x18] sm:$0xff]  ;;  %v281_v20 = vld [vmem:[%s193_s6 + $0x20] sm:$0xff]  ;;  %v283_v22 = vmul.f32 %v277_v13, %v277_v13 }
  0x3a   : > { %s749_s9 = scalar_lea.vmem %s795_s2, %s432_s27  ;;  %v244_v17 = vsel %vm228_vm0, %v238_v9, 0.0  ;;  %v282_v21 = vld [vmem:[%s193_s6 + $0x28] sm:$0xff]  ;;  %v246_v24 = vsel %vm228_vm0, %v240_v11, 0.0  ;;  %v249_v25 = vsel %vm228_vm0, %v239_v10, 0.0  ;;  %v284_v28 = vmul.f32 %v278_v14, %v278_v14 }
  0x3b   : > { %229 = vst.msk [vmem:[%s749_s9] sm:$0xff] %vm228_vm0, %v631_v0  ;;  %v245_v23 = vadd.f32 %v244_v17, %v243_v16  ;;  %v251_v26 = vsel %vm228_vm0, %v241_v12, 0.0  ;;  %v250_v27 = vadd.f32 %v249_v25, %v248_v18  ;;  %v285_v29 = vmul.f32 %v279_v15, %v279_v15 }
  0x3c   : > { %v286_v30 = vmul.f32 %v280_v19, %v280_v19  ;;  %v287_v32 = vmul.f32 %v281_v20, %v281_v20  ;;  %v288_v33 = vmul.f32 %v282_v21, %v282_v21  ;;  %v289_v34 = vsel %vm228_vm0, %v283_v22, 0.0 }
  0x3d   : > { %v247_v31 = vadd.f32 %v246_v24, %v245_v23  ;;  %v252_v35 = vadd.f32 %v251_v26, %v250_v27  ;;  %v290_v36 = vsel %vm228_vm0, %v285_v29, 0.0  ;;  %v294_v37 = vsel %vm228_vm0, %v284_v28, 0.0 }
  0x3e   : > { %v295_v38 = vsel %vm228_vm0, %v286_v30, 0.0  ;;  %v291_v39 = vadd.f32 %v290_v36, %v289_v34  ;;  %v292_v40 = vsel %vm228_vm0, %v287_v32, 0.0  ;;  %v297_v42 = vsel %vm228_vm0, %v288_v33, 0.0 }
  0x3f   : > { %507 = vrsqrt.f32 %v247_v31  ;;  %v296_v41 = vadd.f32 %v295_v38, %v294_v37  ;;  %vm255_vm1 = vcmp.eq.f32.partialorder %v247_v31, inf  ;;  %v258_v46 = vand.u32 2147483648, %v247_v31 }
  0x40   : > { %509 = vrsqrt.f32 %v252_v35  ;;  %v293_v43 = vadd.f32 %v292_v40, %v291_v39  ;;  %vm257_vm2 = vcmp.eq.f32.partialorder %v247_v31, 0.0  ;;  %vm262_vm3 = vcmp.eq.f32.partialorder %v252_v35, inf }
  0x41   : > { %v298_v44 = vadd.f32 %v297_v42, %v296_v41  ;;  %v265_v49 = vand.u32 2147483648, %v252_v35  ;;  %vm264_vm4 = vcmp.eq.f32.partialorder %v252_v35, 0.0 }
  0x42   : > { %511 = vrsqrt.f32 %v293_v43  ;;  %vm301_vm5 = vcmp.eq.f32.partialorder %v293_v43, inf  ;;  %vm303_vm6 = vcmp.eq.f32.partialorder %v293_v43, 0.0  ;;  %v304_v58 = vand.u32 2147483648, %v293_v43  ;;  %v274_v4 = vld [vmem:[%s749_s9] sm:$0xff] }
  0x43   : > { %513 = vrsqrt.f32 %v298_v44  ;;  %vm308_vm7 = vcmp.eq.f32.partialorder %v298_v44, inf  ;;  %v311_v62 = vand.u32 2147483648, %v298_v44  ;;  %vm310_vm8 = vcmp.eq.f32.partialorder %v298_v44, 0.0 }
  0x4c   : > { %v508_v45 = vpop.eup %507 }
  0x4d   : > { %v510_v47 = vpop.eup %509  ;;  %v254_v48 = vmul.f32 %v508_v45, %v247_v31 }
  0x4e   : > { %v261_v50 = vmul.f32 %v510_v47, %v252_v35 }
  0x4f   : > { %v256_v51 = vsel %vm255_vm1, %v247_v31, %v254_v48  ;;  %v512_v56 = vpop.eup %511 }
  0x50   : > { %v259_v52 = vsel %vm257_vm2, %v258_v46, %v256_v51  ;;  %v263_v53 = vsel %vm262_vm3, %v252_v35, %v261_v50  ;;  %v514_v59 = vpop.eup %513  ;;  %v300_v61 = vmul.f32 %v512_v56, %v293_v43 }
  0x51   : > { %v266_v54 = vsel %vm264_vm4, %v265_v49, %v263_v53  ;;  %v433_v55 = vadd.f32 -1.0, %v259_v52  ;;  %v307_v0 = vmul.f32 %v514_v59, %v298_v44 }
  0x52   : > { %v434_v57 = vadd.f32 -1.0, %v266_v54  ;;  %v302_v2 = vsel %vm301_vm5, %v293_v43, %v300_v61 }
  0x53   : > { %v269_v60 = vmul.f32 %v433_v55, %v433_v55  ;;  %v305_v5 = vsel %vm303_vm6, %v304_v58, %v302_v2  ;;  %v309_v6 = vsel %vm308_vm7, %v298_v44, %v307_v0 }
  0x54   : > { %v270_v63 = vmul.f32 %v434_v57, %v434_v57  ;;  %v312_v8 = vsel %vm310_vm8, %v311_v62, %v309_v6  ;;  %v435_v9 = vadd.f32 -1.0, %v305_v5 }
  0x55   : > { %v271_v1 = vsel %vm228_vm0, %v269_v60, 0.0  ;;  %v436_v10 = vadd.f32 -1.0, %v312_v8 }
  0x56   : > { %v272_v3 = vsel %vm228_vm0, %v270_v63, 0.0  ;;  %v315_v12 = vmul.f32 %v435_v9, %v435_v9 }
  0x57   : > { %v273_v7 = vadd.f32 %v272_v3, %v271_v1  ;;  %v316_v13 = vmul.f32 %v436_v10, %v436_v10 }
  0x58   : > { %v317_v14 = vsel %vm228_vm0, %v315_v12, 0.0 }
  0x59   : > { %v275_v11 = vadd.f32 %v274_v4, %v273_v7  ;;  %v318_v15 = vsel %vm228_vm0, %v316_v13, 0.0 }
  0x5a   : > { %v319_v16 = vadd.f32 %v318_v15, %v317_v14 }
  0x5b   : > { %276 = vst.msk [vmem:[%s749_s9] sm:$0xff] %vm228_vm0, %v275_v11 }
  0x62   : > { %v320_v17 = vld [vmem:[%s749_s9] sm:$0xff] }
  0x63   : > { %v321_v18 = vadd.f32 %v320_v17, %v319_v16 }
  0x65   : > { %322 = vst.msk [vmem:[%s749_s9] sm:$0xff] %vm228_vm0, %v321_v18 }
  0x66 PF: > { %s18_s14 = sadd.s32 1, %s625_s14   ;;  %s799_s9 = smov %s609_s10 }
  0x67   : > { %p15_p7 = scmp.ge.s32.totalorder %s18_s14, 4   ;;  %s800_s10 = smov %s613_s11 }
  0x68   : > { %s801_s11 = smov %s692_s20  ;;  %s802_s12 = smov %s621_s13 }
  0x69   : > { %s803_s13 = smov %s805_s16  ;;  %17 = sbr.rel (!%p15_p7) target bundleno = 6 (0x6), region = 85 }
  0x6e   :  { %342 = vsyncpa [#allocation3], 1 }
  0x6f   :  { %344 = vsyncpa [#allocation3 + $0x1], 1 }
  0x70   :  { %345 = vsyncpa [#allocation5], 1 }
  0x71   :  { %347 = vsyncpa [#allocation5 + $0x1], 1 }

</bundles_post_ra>
